<compile_context>
chip_gen: v7x
topology: tpu7x:2x2x1
jax: 0.10.0
libtpu: 0.0.40
codegen_flags: <defaults>
</compile_context>

<pallas_src>
import functools

import jax
import jax.numpy as jnp
from jax.experimental import pallas as pl
from jax.experimental.pallas import tpu as pltpu


def _round_up(x: int, m: int) -> int:
    return ((x + m - 1) // m) * m


def _autoencoder_kernel(x_ref, w1_ref, b1_ref, w2_ref, b2_ref, o_ref):
    # x_ref : (TR, IN)   f32   row tile of the flattened input
    # w1_ref: (IN, ENC)  f32   fc1 weight, pre-transposed
    # b1_ref: (1, ENC)   f32
    # w2_ref: (ENC, IN)  f32   fc2 weight, pre-transposed
    # b2_ref: (1, IN)    f32
    # o_ref : (TR, IN)   f32
    # encoder: relu(x @ W1^T + b1)
    h = jnp.dot(x_ref[...], w1_ref[...], preferred_element_type=jnp.float32)
    h = jnp.maximum(h + b1_ref[...], 0.0)
    # decoder: sigmoid(h @ W2^T + b2)
    y = jnp.dot(h, w2_ref[...], preferred_element_type=jnp.float32)
    o_ref[...] = jax.nn.sigmoid(y + b2_ref[...]).astype(o_ref.dtype)


@functools.partial(
    jax.jit, static_argnames=("input_size", "encoding_dim", "max_row_tile"))
def autoencoder_forward(x, w1, b1, w2, b2, *, input_size, encoding_dim,
                        max_row_tile=4096):
    # Replicate torch's x.reshape(-1, input_size).
    x2d = x.reshape(-1, input_size).astype(jnp.float32)
    rows = x2d.shape[0]
    out_dtype = x2d.dtype

    # ---- static tiling decisions (shapes are static under jit) -------------
    # Multiple of 8 (f32 sublane); aim for >= 2 grid steps so the "parallel"
    # row axis can shard across v7x's two TensorCores; cap at max_row_tile so
    # large batches still pipeline through VMEM with long, efficient DMAs.
    row_tile = min(max_row_tile, max(8, _round_up(pl.cdiv(rows, 2), 8)))
    grid = (pl.cdiv(rows, row_tile),)

    # ---- pre-transpose weights (no padding, no dtype narrowing) ------------
    w1_t = w1.T.astype(jnp.float32)                    # (IN, ENC)
    w2_t = w2.T.astype(jnp.float32)                    # (ENC, IN)
    b1_r = b1.reshape(1, encoding_dim).astype(jnp.float32)
    b2_r = b2.reshape(1, input_size).astype(jnp.float32)

    # ---- explicit VMEM budget (double-buffered tiles + weights + headroom) --
    f32_b = 4
    tile_bytes = row_tile * input_size * f32_b          # one x or out tile
    weight_bytes = (2 * input_size * encoding_dim
                    + encoding_dim + input_size) * f32_b
    need = 2 * 2 * tile_bytes + 2 * weight_bytes        # dbl-buffered in/out + params
    vmem_limit = int(min(max(4 * need, 8 * 1024 * 1024), 48 * 1024 * 1024))

    # Advisory cost estimate: two matmuls + elementwise, sigmoid transcendental,
    # and the real HBM traffic (x read, out write, params).
    cost = pl.CostEstimate(
        flops=4 * rows * input_size * encoding_dim
              + 2 * rows * (encoding_dim + input_size),
        transcendentals=rows * input_size,
        bytes_accessed=f32_b * (2 * rows * input_size
                                + 2 * input_size * encoding_dim
                                + encoding_dim + input_size),
    )

    out = pl.pallas_call(
        _autoencoder_kernel,
        out_shape=jax.ShapeDtypeStruct((rows, input_size), out_dtype),
        grid_spec=pltpu.PrefetchScalarGridSpec(
            num_scalar_prefetch=0,
            grid=grid,
            in_specs=[
                pl.BlockSpec((row_tile, input_size), lambda i: (i, 0)),
                pl.BlockSpec((input_size, encoding_dim), lambda i: (0, 0)),
                pl.BlockSpec((1, encoding_dim), lambda i: (0, 0)),
                pl.BlockSpec((encoding_dim, input_size), lambda i: (0, 0)),
                pl.BlockSpec((1, input_size), lambda i: (0, 0)),
            ],
            out_specs=pl.BlockSpec((row_tile, input_size), lambda i: (i, 0)),
        ),
        compiler_params=pltpu.CompilerParams(
            dimension_semantics=("parallel",),
            vmem_limit_bytes=vmem_limit,
        ),
        cost_estimate=cost,
    )(x2d, w1_t, b1_r, w2_t, b2_r)

    return out


def _ref_forward_f32(x, w1, b1, w2, b2, input_size):
    x2d = x.reshape(-1, input_size).astype(jnp.float32)
    h = jnp.maximum(x2d @ w1.T + b1, 0.0)
    return jax.nn.sigmoid(h @ w2.T + b2)


if __name__ == "__main__":
    input_size = 64
    encoding_dim = 32

    key = jax.random.PRNGKey(0)
    kx, kw1, kb1, kw2, kb2, kx2 = jax.random.split(key, 6)

    # Input: (2, 8, 64) -> flattens to (16, 64) rows of input_size features.
    x = jax.random.normal(kx, (2, 8, input_size), dtype=jnp.float32)

    # PyTorch Linear shapes: W (out, in), b (out,).
    bound1 = 1.0 / (input_size ** 0.5)
    w1 = jax.random.uniform(kw1, (encoding_dim, input_size), jnp.float32,
                            -bound1, bound1)
    b1 = jax.random.uniform(kb1, (encoding_dim,), jnp.float32, -bound1, bound1)
    bound2 = 1.0 / (encoding_dim ** 0.5)
    w2 = jax.random.uniform(kw2, (input_size, encoding_dim), jnp.float32,
                            -bound2, bound2)
    b2 = jax.random.uniform(kb2, (input_size,), jnp.float32, -bound2, bound2)

    out = autoencoder_forward(
        x, w1, b1, w2, b2, input_size=input_size, encoding_dim=encoding_dim)
    out = jax.block_until_ready(out)

    assert out.shape == (16, input_size)
    ref = _ref_forward_f32(x, w1, b1, w2, b2, input_size)
    assert jnp.allclose(out, ref, atol=2e-2, rtol=2e-2), \
        "mismatch vs f32 reference"

    # Ragged row count (13 rows) to exercise the partial last grid block.
    x_ragged = jax.random.normal(kx2, (13, input_size), dtype=jnp.float32)
    out_r = autoencoder_forward(
        x_ragged, w1, b1, w2, b2,
        input_size=input_size, encoding_dim=encoding_dim)
    out_r = jax.block_until_ready(out_r)
    assert out_r.shape == (13, input_size)
    ref_r = _ref_forward_f32(x_ragged, w1, b1, w2, b2, input_size)
    assert jnp.allclose(out_r, ref_r, atol=2e-2, rtol=2e-2), \
        "mismatch vs f32 reference (partial last block)"

    print("KERNEL_OK")
</pallas_src>

<mosaic_0001>
module attributes {stable_mosaic.version = 11 : i64} {
  func.func @_autoencoder_kernel(%arg0: i32, %arg1: memref<8x64xf32, #tpu.memory_space<vmem>>, %arg2: memref<64x32xf32, #tpu.memory_space<vmem>>, %arg3: memref<1x32xf32, #tpu.memory_space<vmem>>, %arg4: memref<32x64xf32, #tpu.memory_space<vmem>>, %arg5: memref<1x64xf32, #tpu.memory_space<vmem>>, %arg6: memref<8x64xf32, #tpu.memory_space<vmem>>) attributes {dimension_semantics = [#tpu.dimension_semantics<parallel>], iteration_bounds = array<i64: 2>, scalar_prefetch = 0 : i64, scratch_operands = 0 : i64, tpu.core_type = #tpu.core_type<tc>, window_params = [{transform_indices = @transform_0, window_bounds = array<i64: 8, 64>}, {pipeline_mode = #tpu.pipeline_mode<synchronous>, transform_indices = @transform_1, window_bounds = array<i64: 64, 32>}, {pipeline_mode = #tpu.pipeline_mode<synchronous>, transform_indices = @transform_2, window_bounds = array<i64: 1, 32>}, {pipeline_mode = #tpu.pipeline_mode<synchronous>, transform_indices = @transform_3, window_bounds = array<i64: 32, 64>}, {pipeline_mode = #tpu.pipeline_mode<synchronous>, transform_indices = @transform_4, window_bounds = array<i64: 1, 64>}, {transform_indices = @transform_5, window_bounds = array<i64: 8, 64>}]} {
    %c0 = arith.constant 0 : index
    %c0_0 = arith.constant 0 : index
    %0 = vector.load %arg1[%c0, %c0_0] : memref<8x64xf32, #tpu.memory_space<vmem>>, vector<8x64xf32>
    %c0_1 = arith.constant 0 : index
    %c0_2 = arith.constant 0 : index
    %1 = vector.load %arg2[%c0_1, %c0_2] : memref<64x32xf32, #tpu.memory_space<vmem>>, vector<64x32xf32>
    %cst = arith.constant dense<0.000000e+00> : vector<8x32xf32>
    %2 = tpu.matmul %0, %1, %cst {dimension_numbers = #tpu.dot_dimension_numbers<[1], [0], [0], [1], [0, 0, 1, 1], [], []>} : vector<8x64xf32>, vector<64x32xf32>, vector<8x32xf32> -> vector<8x32xf32>
    %c0_3 = arith.constant 0 : index
    %c0_4 = arith.constant 0 : index
    %3 = vector.load %arg3[%c0_3, %c0_4] : memref<1x32xf32, #tpu.memory_space<vmem>>, vector<1x32xf32>
    %4 = vector.broadcast %3 : vector<1x32xf32> to vector<8x32xf32>
    %5 = arith.addf %2, %4 : vector<8x32xf32>
    %cst_5 = arith.constant 0.000000e+00 : f32
    %6 = vector.broadcast %cst_5 : f32 to vector<8x32xf32>
    %7 = arith.maximumf %5, %6 : vector<8x32xf32>
    %c0_6 = arith.constant 0 : index
    %c0_7 = arith.constant 0 : index
    %8 = vector.load %arg4[%c0_6, %c0_7] : memref<32x64xf32, #tpu.memory_space<vmem>>, vector<32x64xf32>
    %cst_8 = arith.constant dense<0.000000e+00> : vector<8x64xf32>
    %9 = tpu.matmul %7, %8, %cst_8 {dimension_numbers = #tpu.dot_dimension_numbers<[1], [0], [0], [1], [0, 0, 1, 1], [], []>} : vector<8x32xf32>, vector<32x64xf32>, vector<8x64xf32> -> vector<8x64xf32>
    %c0_9 = arith.constant 0 : index
    %c0_10 = arith.constant 0 : index
    %10 = vector.load %arg5[%c0_9, %c0_10] : memref<1x64xf32, #tpu.memory_space<vmem>>, vector<1x64xf32>
    %11 = vector.broadcast %10 : vector<1x64xf32> to vector<8x64xf32>
    %12 = arith.addf %9, %11 : vector<8x64xf32>
    %13 = arith.negf %12 : vector<8x64xf32>
    %14 = math.exp %13 : vector<8x64xf32>
    %cst_11 = arith.constant 1.000000e+00 : f32
    %15 = vector.broadcast %cst_11 : f32 to vector<8x64xf32>
    %16 = arith.addf %15, %14 : vector<8x64xf32>
    %17 = arith.divf %15, %16 : vector<8x64xf32>
    %c0_12 = arith.constant 0 : index
    %c0_13 = arith.constant 0 : index
    %18 = vector.load %arg6[%c0_12, %c0_13] : memref<8x64xf32, #tpu.memory_space<vmem>>, vector<8x64xf32>
    tpu.vector_store %arg6[%c0_12, %c0_13], %17 {strides = array<i32>} : memref<8x64xf32, #tpu.memory_space<vmem>>, vector<8x64xf32>,
    return
  }
  func.func @transform_0(%arg0: i32) -> (i32, i32) {
    %c0_i32 = arith.constant 0 : i32
    %c0_i32_0 = arith.constant 0 : i32
    return %arg0, %c0_i32 : i32, i32
  }
  func.func @transform_1(%arg0: i32) -> (i32, i32) {
    %c0_i32 = arith.constant 0 : i32
    %c0_i32_0 = arith.constant 0 : i32
    %c0_i32_1 = arith.constant 0 : i32
    return %c0_i32, %c0_i32_0 : i32, i32
  }
  func.func @transform_2(%arg0: i32) -> (i32, i32) {
    %c0_i32 = arith.constant 0 : i32
    %c0_i32_0 = arith.constant 0 : i32
    %c0_i32_1 = arith.constant 0 : i32
    return %c0_i32, %c0_i32_0 : i32, i32
  }
  func.func @transform_3(%arg0: i32) -> (i32, i32) {
    %c0_i32 = arith.constant 0 : i32
    %c0_i32_0 = arith.constant 0 : i32
    %c0_i32_1 = arith.constant 0 : i32
    return %c0_i32, %c0_i32_0 : i32, i32
  }
  func.func @transform_4(%arg0: i32) -> (i32, i32) {
    %c0_i32 = arith.constant 0 : i32
    %c0_i32_0 = arith.constant 0 : i32
    %c0_i32_1 = arith.constant 0 : i32
    return %c0_i32, %c0_i32_0 : i32, i32
  }
  func.func @transform_5(%arg0: i32) -> (i32, i32) {
    %c0_i32 = arith.constant 0 : i32
    %c0_i32_0 = arith.constant 0 : i32
    return %arg0, %c0_i32 : i32, i32
  }
}

</mosaic_0001>

<bundles_post_ra>
// kernel: autoencoder_forward.1
= control target key start
LH: loop header
LB: loop body
LE: loop exit
PB: predicated region body
PF: predicated region fallthrough
CT: control target
= control target key end

     0   :  { %10 = vsyncpa [#allocation3], 0  ;;  %s841_s0 = inlined_call_operand.vmem [shape: f32[16,64], index: 0, kind: input, shape index: {}]   ;;  %s842_s1 = inlined_call_operand.vmem [shape: f32[64,32], index: 1, kind: input, shape index: {}]   ;;  %s843_s2 = inlined_call_operand.vmem [shape: f32[1,32], index: 2, kind: input, shape index: {}]   ;;  %s844_s3 = inlined_call_operand.vmem [shape: f32[32,64], index: 3, kind: input, shape index: {}]   ;;  %s845_s4 = inlined_call_operand.vmem [shape: f32[1,64], index: 4, kind: input, shape index: {}]   ;;  %s846_s5 = inlined_call_operand.hbm [shape: f32[16,64], index: 5, kind: output, shape index: {}]  }
   0x1   :  { %12 = vsyncpa [#allocation3 + $0x1], 0  ;;  %s697_s18 = smov 0   ;;  %s699_s19 = smov 0  }
   0x2   :  { %s701_s20 = smov 0   ;;  %s703_s21 = smov 0  }
   0x3 LB: > { %s718_s22 = sadd.s32 4294967295, %s661_s21   ;;  %s476_s23 = sadd.s32 4294967294, %s661_s21   ;;  %s661_s21 = sphi %s703_s21, %s852_s21   ;;  %s657_s20 = sphi %s701_s20, %s851_s20   ;;  %s653_s19 = sphi %s699_s19, %s850_s19   ;;  %s649_s18 = sphi %s697_s18, %s849_s18  }
   0x4   : > { %s722_s24 = sadd.s32 1, %s661_s21   ;;  %s135_s25 = sadd.s32 1, %s657_s20 }
   0x5   : > { %s132_s26 = ssub.s32 %s661_s21, %s722_s24  ;;  %p145_p0 = scmp.ne.s32.totalorder %s657_s20, %s653_s19 }
   0x6   : > { %p133_p1 = scmp.eq.s32.totalorder %s132_s26, 0  ;;  %p146_p2 = scmp.eq.s32.totalorder %s718_s22, 1 }
   0x7   : > { %p151_p3 = scmp.ne.s32.totalorder %s653_s19, %s649_s18  ;;  %p152_p4 = scmp.eq.s32.totalorder %s476_s23, 1 }
   0x8   : > { %s733_s27 = scalar_select %p133_p1, %s657_s20, %s135_s25  }
   0x9   : > { %p735_p5 = por %p146_p2, %p145_p0  ;;  %p739_p6 = por %p152_p4, %p151_p3 }
   0xa   : > { %p479_p7 = scmp.ge.s32.totalorder %s661_s21, 1  ;;  %p189_p8 = scmp.lt.s32.totalorder %s661_s21, 3 }
   0xc   : > { %p190_p9 = pnand %p479_p7, %p189_p8 }
   0xd   : > { %v221_v0 = vld [vmem:[%s842_s1] sm:$0xff] (!%p190_p9)  ;;  %v222_v1 = vld [vmem:[%s842_s1 + $0x8] sm:$0xff] (!%p190_p9)  ;;  %v223_v2 = vld [vmem:[%s842_s1 + $0x10] sm:$0xff] (!%p190_p9)  ;;  %v663_v3 = vmov (!%p190_p9), 0.0|0.0   ;;  %vm664_vm0 = vmmov (!%p190_p9), 0   ;;  %v665_v6 = vmov (!%p190_p9), 0.0  }
   0xe   : > { %193 = sbr.rel (%p190_p9) target bundleno = 501 (0x1f5), region = 40  ;;  %535 = vmatprep.subr.bf16.mxu0 (!%p190_p9), %v663_v3  ;;  %v536_v4 = vpack.c.bf16 (!%p190_p9), %v222_v1, %v221_v0  ;;  %v224_v5 = vld [vmem:[%s842_s1 + $0x18] sm:$0xff] (!%p190_p9)  ;;  %521 = vmatprep.mubr.msk.f32.mxu0 (!%p190_p9), %vm664_vm0, %v665_v6  ;;  %p216_p10 = scmp.lt.s32.totalorder (!%p190_p9), %s718_s22, 1  ;;  %v311_v7 = vld [vmem:[%s844_s3] sm:$0xff] (!%p190_p9)  ;;  %v312_v9 = vld [vmem:[%s844_s3 + $0x8] sm:$0xff] (!%p190_p9)  ;;  %vm236_vm1 = vcmask (!%p190_p9), 523264  }
   0xf   : > { %547 = vmatprep.subr.bf16.mxu1 (!%p190_p9), %v663_v3  ;;  %532 = vmatprep.mubr.msk.f32.mxu1 (!%p190_p9), %vm664_vm0, %v665_v6  ;;  %v539_v8 = vpack.c.bf16 (!%p190_p9), %v224_v5, %v223_v2  ;;  %v225_v10 = vld [vmem:[%s842_s1 + $0x20] sm:$0xff] (!%p190_p9)  ;;  %v226_v11 = vld [vmem:[%s842_s1 + $0x28] sm:$0xff] (!%p190_p9)  ;;  %v548_v12 = vpack.c.bf16 (!%p190_p9), %v312_v9, %v311_v7  ;;  %v227_v14 = vld [vmem:[%s842_s1 + $0x30] sm:$0xff] (!%p190_p9)  ;;  %vm322_vm2 = vcmask (!%p190_p9), 261120   ;;  %s213_s6 = sand.u32 (!%p190_p9), 1, %s653_s19   ;;  %s488_s8 = sshll.u32 (!%p190_p9), %s718_s22, 7 }
  0x10   : > { %537 = vmatpush3.bf16.msra.mxu0 (!%p190_p9), %v536_v4  ;;  %v542_v13 = vpack.c.bf16 (!%p190_p9), %v226_v11, %v225_v10  ;;  %v228_v15 = vld [vmem:[%s842_s1 + $0x38] sm:$0xff] (!%p190_p9)  ;;  %v313_v18 = vld [vmem:[%s844_s3 + $0x10] sm:$0xff] (!%p190_p9)  ;;  %v482_v21 = vld [vmem:[%s843_s2] ss:$0 sm:$0xff] (!%p190_p9)  ;;  %s480_s7 = sshll.u32 (!%p190_p9), %s213_s6, 3  ;;  %s404_s14 = scalar_lea.sflag (!%p190_p9), [#allocation3], %s213_s6 }
  0x11   : > { %538 = vmatprep.subr.bf16.mxu0 (!%p190_p9), %v663_v3  ;;  %549 = vmatpush3.bf16.msra.mxu1 (!%p190_p9), %v548_v12  ;;  %v545_v16 = vpack.c.bf16 (!%p190_p9), %v228_v15, %v227_v14  ;;  %v314_v19 = vld [vmem:[%s844_s3 + $0x18] sm:$0xff] (!%p190_p9)  ;;  %v484_v26 = vld [vmem:[%s845_s4] ss:$0 sm:$0xff] (!%p190_p9)  ;;  %s215_s9 = scalar_lea.vmem (!%p190_p9), [#allocation2], %s480_s7 }
  0x12   : > { %550 = vmatprep.subr.bf16.mxu1 (!%p190_p9), %v663_v3  ;;  %v551_v20 = vpack.c.bf16 (!%p190_p9), %v314_v19, %v313_v18 }
  0x14   : > { %540 = vmatpush3.bf16.msra.mxu0 (!%p190_p9), %v539_v8 }
  0x15   : > { %s217_s30 = scalar_select %p216_p10, %s718_s22, 1  ;;  %541 = vmatprep.subr.bf16.mxu0 %v663_v3  ;;  %552 = vmatpush3.bf16.msra.mxu1 %v551_v20 }
  0x16   : > { %s666_s22 = smov [#allocation2]  }
  0x17   : > { %s481_s10 = sshll.u32 %s217_s30, 3  ;;  %s603_s16 = sshll.u32 %s666_s22, 4  ;;  %s604_s16 = int_to_ptr.vmem [resolvable:$false] %s603_s16 }
  0x18   : > { %543 = vmatpush3.bf16.msra.mxu0 %v542_v13  ;;  %s219_s13 = scalar_lea.vmem %s841_s0, %s481_s10  ;;  %s417_s10 = sshll.u32 %s215_s9, 4  ;;  %s800_s10 = int_to_ptr.vmem [resolvable:$true] %s417_s10 }
  0x19   : > { %544 = vmatprep.subr.bf16.mxu0 %v663_v3  ;;  %v220_v17 = vld [vmem:[%s219_s13] sm:$0xff]  ;;  %s798_s13 = scalar_lea.hbm %s846_s5, %s488_s8  ;;  %s599_s15 = scalar_lea.vmem %s800_s10, 128 }
  0x1a   : > { %p600_p11 = scmp.ne.s32.totalorder %s800_s10, %s599_s15  ;;  %s605_s17 = scalar_lea.vmem %s604_s16, 256 }
  0x1b   : > { %p606_p0 = scmp.lt.s32.totalorder %s800_s10, %s604_s16  ;;  %p607_p1 = scmp.lt.s32.totalorder %s605_s17, %s599_s15 }
  0x1c   : > { %546 = vmatpush3.bf16.msra.mxu0 %v545_v16  ;;  %p601_p12 = pnand %p600_p11, %p735_p5 }
  0x1d   : > { %p608_p2 = por %p607_p1, %p606_p0 }
  0x1e   : > { %p602_p13 = pneg %p601_p12 }
  0x1f   : > { %522 = vmatmul.mubr.msk.f32.vlgmr.msra.gmra.mrb[0].mxu0 %vm236_vm1, %v220_v17 }
  0x20   : > { %p609_p3 = pnand %p608_p2, %p602_p13 }
  0xf2   : > { %v306_v22 = vpop.f32.mrb[0].mxu0 }
  0xf3   : > { %v307_v23 = vadd.f32 %v482_v21, %v306_v22  ;;  %v523_v24 = vpop.f32.mrb[1].mxu0 }
  0xf5   : > { %v310_v25 = vmax.f32 %v307_v23, 0.0 }
  0xf7   : > { %533 = vmatmul.mubr.msk.f32.vlgmr.msra.gmra.mrb[0].mxu1 %vm322_vm2, %v310_v25 }
 0x1ca   : > { %v392_v27 = vpop.f32.mrb[0].mxu1 }
 0x1cb   : > { %v393_v28 = vadd.f32 %v484_v26, %v392_v27  ;;  %v534_v29 = vpop.f32.mrb[1].mxu1 }
 0x1cd   : > { %v486_v30 = vmul.f32 -1.442695, %v393_v28 }
 0x1cf   : > { %595 = vpow2.f32 %v486_v30 }
 0x1d9   : > { %v596_v31 = vpop.eup %595 }
 0x1da   : > { %v399_v32 = vadd.f32 1.0, %v596_v31 }
 0x1dc   : > { %597 = vrcp.f32 %v399_v32 }
 0x1e6   : > { %v598_v33 = vpop.eup %597 }
 0x1e7   : > { %402 = vst.msk [vmem:[%s215_s9] sm:$0xff] %vm236_vm1, %v598_v33 }
 0x1e8   : > { %612 = shalt.err (!%p609_p3)
}
 0x1e9   : > { %s613_s23 = scalar_lea.hbm %s798_s13, 128  ;;  %s617_s30 = scalar_lea.hbm %s846_s5, 256 }
 0x1ea   : > { %p614_p4 = scmp.ne.s32.totalorder %s798_s13, %s613_s23  ;;  %p618_p9 = scmp.lt.u32.totalorder %s798_s13, %s846_s5 }
 0x1eb   : > { %p619_p10 = scmp.lt.u32.totalorder %s617_s30, %s613_s23  ;;  %p621_p12 = scmp.lt.u32.totalorder %s613_s23, %s798_s13 }
 0x1ec   : > { %p615_p7 = pnand %p614_p4, %p735_p5 }
 0x1ed   : > { %p620_p11 = por %p619_p10, %p618_p9 }
 0x1ee   : > { %p616_p8 = pneg %p615_p7 }
 0x1ef   : > { %p622_p13 = por %p621_p12, %p620_p11 }
 0x1f1   : > { %p623_p0 = pnand %p622_p13, %p616_p8 }
 0x1f3   : > { %626 = shalt.err (!%p623_p0)
}
 0x1f4   : > { %553 = dma.vmem_to_hbm [thread:$0]  (%p735_p5), %s800_s10, 128, %s798_s13, %s404_s14  }
 0x1f5 PF: > { %p559_p1 = scmp.ge.s32.totalorder %s661_s21, 2  ;;  %s429_s8 = sand.u32 1, %s649_s18  }
 0x1f6   : > { %s430_s9 = scalar_lea.sflag [#allocation3], %s429_s8 }
 0x1f7   : > { %p556_p2 = pnand %p559_p1, %p739_p6 }
 0x1f9   : > { %644 = dma.done.wait (!%p556_p2), %s430_s9, 128  }
 0x1fa   : > { %646 = vsyncadd (!%p556_p2), %s430_s9, 4294967168  ;;  %p15_p3 = scmp.ge.s32.totalorder %s722_s24, 4   ;;  %s849_s18 = smov %s653_s19 }
 0x1fb   : > { %s850_s19 = smov %s657_s20  ;;  %s851_s20 = smov %s733_s27 }
 0x1fc   : > { %s852_s21 = smov %s722_s24  ;;  %17 = sbr.rel (!%p15_p3) target bundleno = 3 (0x3), region = 75 }
 0x203   :  { %435 = vsyncpa [#allocation3], 1 }
 0x204   :  { %437 = vsyncpa [#allocation3 + $0x1], 1 }

</bundles_post_ra>
